<compile_context>
chip_gen: v6e
topology: v6e:2x2x1
jax: 0.10.0
libtpu: 0.0.40
codegen_flags: <defaults>
</compile_context>

<pallas_src>
import jax
import jax.numpy as jnp
from jax.experimental import pallas as pl
from jax.experimental.pallas import tpu as pltpu


# ---- model config (small, synthetic; real EfficientNet-b0 head would be C=1536) ----
N_FEATURES = 256      # stand-in for dimdict[TIMM_MODEL]
CLASS_NUM = 16        # stand-in for config.class_num
N_PAD = 128           # lane-dense classifier width (logits padded to 128 lanes)
FEAT_H = 8
FEAT_W = 8

# Below this batch, the replicated-weight MXU-pooling path isn't worth the extra
# resident weight in VMEM; use the in-kernel reduce path instead.
_MXU_POOL_MIN_BATCH = 64


def _round_up(x, m):
    return ((x + m - 1) // m) * m


# --------------------------------------------------------------------------------------
# One-time parameter preparation (hoisted out of the per-call forward; compute once).
# --------------------------------------------------------------------------------------
def prepare_head_params(w_t, bias, hw):
    """w_t: [C, CLASS_NUM] (torch Linear weight [out, in], transposed); bias: [CLASS_NUM].

    Folds the 1/HW mean scale into the weights, zero-pads the output dim to a lane-dense
    128, casts weights to bf16 (MXU-native rate; accumulation stays f32 in-kernel), and
    builds the HW-replicated weight used by the large-batch MXU-pooling path.
    """
    C, n_out = w_t.shape
    w_scaled = w_t.astype(jnp.float32) / float(hw)
    w_pad = (jnp.zeros((C, N_PAD), jnp.float32)
             .at[:, :n_out].set(w_scaled)
             .astype(jnp.bfloat16))                                    # [C, 128] bf16
    # Replicate over HW so pooling becomes part of one matmul over the NCHW flatten
    # [B, C*HW]: w_rep[c*HW + s, :] == w_pad[c, :] for every spatial position s.
    w_rep = jnp.broadcast_to(w_pad[:, None, :], (C, hw, N_PAD)).reshape(C * hw, N_PAD)
    bias_p = jnp.zeros((1, N_PAD), jnp.float32).at[0, :n_out].set(bias.astype(jnp.float32))
    return {
        "w_pad": w_pad,    # [C, N_PAD]     bf16  (tiny-batch reduce path)
        "w_rep": w_rep,    # [C*HW, N_PAD]  bf16  (large-batch MXU path)
        "bias_p": bias_p,  # [1, N_PAD]     f32
        "hw": hw,
        "n_out": n_out,
    }


# --------------------------------------------------------------------------------------
# Kernels
# --------------------------------------------------------------------------------------
def _mxu_pool_kernel(x_ref, w_ref, b_ref, out_ref):
    """Pool + classify as a single lane-dense MXU matmul.

    x_ref  : [BM, C*HW]   bf16  NCHW feature map, (C, HW) flattened on lanes
    w_ref  : [C*HW, 128]  bf16  classifier weight replicated over HW, 1/HW folded in
    b_ref  : [1, 128]     f32
    out_ref: [BM, 128]    f32
    """
    out_ref[...] = (
        jnp.dot(x_ref[...], w_ref[...], preferred_element_type=jnp.float32) + b_ref[...]
    )


def _reduce_pool_kernel(feats_ref, w_ref, b_ref, out_ref):
    """Tiny-batch path: fused f32-accumulate lane reduce + small matmul.

    feats_ref: [BM, C, HW]  bf16/f32
    w_ref    : [C, 128]     bf16 (1/HW folded in)
    b_ref    : [1, 128]     f32
    out_ref  : [BM, 128]    f32
    """
    # f32 accumulation without materializing a full f32 copy of the block.
    pooled = jnp.sum(feats_ref[...], axis=-1, dtype=jnp.float32)       # [BM, C]
    out_ref[...] = (
        jnp.dot(pooled.astype(jnp.bfloat16), w_ref[...],
                preferred_element_type=jnp.float32)
        + b_ref[...]
    )


# --------------------------------------------------------------------------------------
# Forward (matches terrorismNet.forward: logits + detached feature-map passthrough)
# --------------------------------------------------------------------------------------
def terrorism_net_forward(feats_nchw, params):
    """feats_nchw: [B, C, H, W] backbone output (bf16 preferred).
    params: output of prepare_head_params (computed once, reused every call)."""
    B, C, H, W = feats_nchw.shape
    hw = H * W
    assert hw == params["hw"] and params["w_pad"].shape == (C, N_PAD)
    bias_p = params["bias_p"]
    n_out = params["n_out"]

    if B >= _MXU_POOL_MIN_BATCH:
        # ---- large-batch path: pooling folded into one lane-dense MXU matmul ----
        chw = C * hw
        bm = min(128, _round_up(B, 8))
        n_blocks = pl.cdiv(B, bm)
        rows = n_blocks * bm
        x = feats_nchw.reshape(B, chw)            # free contiguous reshape of NCHW
        if rows != B:                             # pad: no block reads undefined rows
            x = jnp.pad(x, ((0, rows - B), (0, 0)))

        itemsize = x.dtype.itemsize
        # double-buffered feats block + double-buffered resident weight + outputs + slack
        vmem_bytes = (2 * bm * chw * itemsize
                      + 2 * chw * N_PAD * 2
                      + 2 * bm * N_PAD * 4
                      + (4 << 20))
        cost = pl.CostEstimate(
            flops=2 * rows * chw * N_PAD,
            transcendentals=0,
            bytes_accessed=(rows * chw * itemsize + chw * N_PAD * 2
                            + N_PAD * 4 + rows * N_PAD * 4),
        )
        logits_padded = pl.pallas_call(
            _mxu_pool_kernel,
            out_shape=jax.ShapeDtypeStruct((rows, N_PAD), jnp.float32),
            grid=(n_blocks,),
            in_specs=[
                pl.BlockSpec((bm, chw), lambda i: (i, 0)),
                pl.BlockSpec((chw, N_PAD), lambda i: (0, 0)),
                pl.BlockSpec((1, N_PAD), lambda i: (0, 0)),
            ],
            out_specs=pl.BlockSpec((bm, N_PAD), lambda i: (i, 0)),
            compiler_params=pltpu.CompilerParams(
                dimension_semantics=("parallel",),
                vmem_limit_bytes=vmem_bytes),
            cost_estimate=cost,
        )(x, params["w_rep"], bias_p)
    else:
        # ---- tiny-batch path: in-kernel reduce, no replicated weight resident ----
        bm = B if B <= 8 else 8
        n_blocks = pl.cdiv(B, bm)
        rows = n_blocks * bm
        feats_k = feats_nchw.reshape(B, C, hw)    # free contiguous reshape of NCHW
        if rows != B:
            feats_k = jnp.pad(feats_k, ((0, rows - B), (0, 0), (0, 0)))

        itemsize = feats_k.dtype.itemsize
        cost = pl.CostEstimate(
            flops=2 * rows * C * hw + 2 * rows * C * N_PAD,
            transcendentals=0,
            bytes_accessed=(rows * C * hw * itemsize + C * N_PAD * 2
                            + N_PAD * 4 + rows * N_PAD * 4),
        )
        logits_padded = pl.pallas_call(
            _reduce_pool_kernel,
            out_shape=jax.ShapeDtypeStruct((rows, N_PAD), jnp.float32),
            grid=(n_blocks,),
            in_specs=[
                pl.BlockSpec((bm, C, hw), lambda i: (i, 0, 0)),
                pl.BlockSpec((C, N_PAD), lambda i: (0, 0)),
                pl.BlockSpec((1, N_PAD), lambda i: (0, 0)),
            ],
            out_specs=pl.BlockSpec((bm, N_PAD), lambda i: (i, 0)),
            compiler_params=pltpu.CompilerParams(
                dimension_semantics=("parallel",)),
            cost_estimate=cost,
        )(feats_k, params["w_pad"], bias_p)

    logits = logits_padded[:B, :n_out]
    # PyTorch returns (logits, x.detach()): block gradients through the passthrough.
    return logits, jax.lax.stop_gradient(feats_nchw)


def _reference(feats_nchw, w_t, bias):
    f32 = feats_nchw.astype(jnp.float32)
    pooled = jnp.mean(f32, axis=(2, 3))                        # [B, C]
    return pooled @ w_t.astype(jnp.float32) + bias.astype(jnp.float32)[None, :]


if __name__ == "__main__":
    key = jax.random.PRNGKey(0)
    k_feat, k_feat2, k_w, k_b = jax.random.split(key, 4)

    # torch Linear weight is [out, in]; store the transpose [in, out] here.
    w_t = jax.random.normal(k_w, (N_FEATURES, CLASS_NUM), dtype=jnp.float32) * 0.02
    bias = jax.random.normal(k_b, (CLASS_NUM,), dtype=jnp.float32) * 0.01

    # One-time parameter preparation (hoisted out of the per-call forward).
    params = prepare_head_params(w_t, bias, FEAT_H * FEAT_W)

    # --- tiny-batch path (B=2): in-kernel f32-accumulate reduce + small matmul ---
    feats_small = jax.random.normal(
        k_feat, (2, N_FEATURES, FEAT_H, FEAT_W), dtype=jnp.bfloat16)
    logits_s, feats_out_s = terrorism_net_forward(feats_small, params)
    logits_s = jax.block_until_ready(logits_s)
    feats_out_s = jax.block_until_ready(feats_out_s)
    assert logits_s.shape == (2, CLASS_NUM)
    assert feats_out_s.shape == feats_small.shape
    assert jnp.allclose(logits_s, _reference(feats_small, w_t, bias),
                        atol=2e-3, rtol=2e-2)

    # --- large-batch path (B=128): lane-dense MXU pooling matmul ---
    feats_big = jax.random.normal(
        k_feat2, (128, N_FEATURES, FEAT_H, FEAT_W), dtype=jnp.bfloat16)
    logits_b, feats_out_b = terrorism_net_forward(feats_big, params)
    logits_b = jax.block_until_ready(logits_b)
    feats_out_b = jax.block_until_ready(feats_out_b)
    assert logits_b.shape == (128, CLASS_NUM)
    assert jnp.allclose(logits_b, _reference(feats_big, w_t, bias),
                        atol=2e-3, rtol=2e-2)

    print("KERNEL_OK")
</pallas_src>

<mosaic_0001>
module attributes {stable_mosaic.version = 11 : i64} {
  func.func @_reduce_pool_kernel(%arg0: i32, %arg1: memref<2x256x64xbf16, #tpu.memory_space<vmem>>, %arg2: memref<256x128xbf16, #tpu.memory_space<vmem>>, %arg3: memref<1x128xf32, #tpu.memory_space<vmem>>, %arg4: memref<2x128xf32, #tpu.memory_space<vmem>>) attributes {dimension_semantics = [#tpu.dimension_semantics<parallel>], iteration_bounds = array<i64: 1>, scalar_prefetch = 0 : i64, scratch_operands = 0 : i64, tpu.core_type = #tpu.core_type<tc>, window_params = [{transform_indices = @transform_0, window_bounds = array<i64: 2, 256, 64>}, {pipeline_mode = #tpu.pipeline_mode<synchronous>, transform_indices = @transform_1, window_bounds = array<i64: 256, 128>}, {pipeline_mode = #tpu.pipeline_mode<synchronous>, transform_indices = @transform_2, window_bounds = array<i64: 1, 128>}, {transform_indices = @transform_3, window_bounds = array<i64: 2, 128>}]} {
    %c0 = arith.constant 0 : index
    %c0_0 = arith.constant 0 : index
    %c0_1 = arith.constant 0 : index
    %0 = vector.load %arg1[%c0, %c0_0, %c0_1] : memref<2x256x64xbf16, #tpu.memory_space<vmem>>, vector<2x256x64xbf16>
    %1 = arith.extf %0 : vector<2x256x64xbf16> to vector<2x256x64xf32>
    %cst = arith.constant dense<0.000000e+00> : vector<2x256xf32>
    %2 = vector.multi_reduction <add>, %1, %cst [2] : vector<2x256x64xf32> to vector<2x256xf32>
    %3 = arith.truncf %2 : vector<2x256xf32> to vector<2x256xbf16>
    %c0_2 = arith.constant 0 : index
    %c0_3 = arith.constant 0 : index
    %4 = vector.load %arg2[%c0_2, %c0_3] : memref<256x128xbf16, #tpu.memory_space<vmem>>, vector<256x128xbf16>
    %cst_4 = arith.constant dense<0.000000e+00> : vector<2x128xf32>
    %5 = tpu.matmul %3, %4, %cst_4 {dimension_numbers = #tpu.dot_dimension_numbers<[1], [0], [0], [1], [0, 0, 1, 1], [], []>} : vector<2x256xbf16>, vector<256x128xbf16>, vector<2x128xf32> -> vector<2x128xf32>
    %c0_5 = arith.constant 0 : index
    %c0_6 = arith.constant 0 : index
    %6 = vector.load %arg3[%c0_5, %c0_6] : memref<1x128xf32, #tpu.memory_space<vmem>>, vector<1x128xf32>
    %7 = vector.broadcast %6 : vector<1x128xf32> to vector<2x128xf32>
    %8 = arith.addf %5, %7 : vector<2x128xf32>
    %c0_7 = arith.constant 0 : index
    %c0_8 = arith.constant 0 : index
    %9 = vector.load %arg4[%c0_7, %c0_8] : memref<2x128xf32, #tpu.memory_space<vmem>>, vector<2x128xf32>
    tpu.vector_store %arg4[%c0_7, %c0_8], %8 {strides = array<i32>} : memref<2x128xf32, #tpu.memory_space<vmem>>, vector<2x128xf32>,
    return
  }
  func.func @transform_0(%arg0: i32) -> (i32, i32, i32) {
    %c0_i32 = arith.constant 0 : i32
    %c0_i32_0 = arith.constant 0 : i32
    %c0_i32_1 = arith.constant 0 : i32
    return %arg0, %c0_i32, %c0_i32_0 : i32, i32, i32
  }
  func.func @transform_1(%arg0: i32) -> (i32, i32) {
    %c0_i32 = arith.constant 0 : i32
    %c0_i32_0 = arith.constant 0 : i32
    %c0_i32_1 = arith.constant 0 : i32
    return %c0_i32, %c0_i32_0 : i32, i32
  }
  func.func @transform_2(%arg0: i32) -> (i32, i32) {
    %c0_i32 = arith.constant 0 : i32
    %c0_i32_0 = arith.constant 0 : i32
    %c0_i32_1 = arith.constant 0 : i32
    return %c0_i32, %c0_i32_0 : i32, i32
  }
  func.func @transform_3(%arg0: i32) -> (i32, i32) {
    %c0_i32 = arith.constant 0 : i32
    %c0_i32_0 = arith.constant 0 : i32
    return %arg0, %c0_i32 : i32, i32
  }
}

</mosaic_0001>

<bundles_post_ra>
// kernel: tpu_custom_call.1
= control target key start
LH: loop header
LB: loop body
LE: loop exit
PB: predicated region body
PF: predicated region fallthrough
CT: control target
= control target key end

     0   :  { %vm144_vm0 = vcmask 523264   ;;  %s1664_s0 = inlined_call_operand.vmem [shape: bf16[2,256,64], index: 0, kind: input, shape index: {}]   ;;  %s1665_s1 = inlined_call_operand.vmem [shape: bf16[256,128], index: 1, kind: input, shape index: {}]   ;;  %s1666_s2 = inlined_call_operand.vmem [shape: f32[1,128], index: 2, kind: input, shape index: {}]   ;;  %s1667_s3 = inlined_call_operand.hbm [shape: f32[2,128], index: 3, kind: output, shape index: {}]  }
   0x1   :  { %v1178_v0 = vld [vmem:[%s1664_s0 + $0xc0] sm:$0xff]   ;;  %v1163_v13 = vld [vmem:[%s1664_s0 + $0x48] sm:$0xff]   ;;  %v1164_v36 = vld [vmem:[%s1664_s0 + $0x50] sm:$0xff]  }
   0x2   :  { %v1162_v1 = vld [vmem:[%s1664_s0 + $0x40] sm:$0xff]   ;;  %v1125_v2 = vunpack.c.l.bf16 %v1178_v0  ;;  %v1126_v4 = vunpack.c.h.bf16 %v1178_v0  ;;  %v1066_v14 = vunpack.c.h.bf16 %v1163_v13  ;;  %v1065_v15 = vunpack.c.l.bf16 %v1163_v13  ;;  %v1179_v23 = vld [vmem:[%s1664_s0 + $0xc8] sm:$0xff]  }
   0x3   :  { %v1061_v3 = vunpack.c.l.bf16 %v1162_v1  ;;  %v1062_v5 = vunpack.c.h.bf16 %v1162_v1  ;;  %v1028_v6 = vld [vmem:[%s1664_s0] sm:$0xff]   ;;  %v1130_v26 = vunpack.c.h.bf16 %v1179_v23  ;;  %v1129_v27 = vunpack.c.l.bf16 %v1179_v23  ;;  %v1155_v28 = vld [vmem:[%s1664_s0 + $0x8] sm:$0xff]  }
   0x4   :  { %v289_v7 = vsel %vm144_vm0, %v1125_v2, 0.0  ;;  %v292_v9 = vsel %vm144_vm0, %v1126_v4, 0.0  ;;  %v1030_v11 = vunpack.c.h.bf16 %v1028_v6  ;;  %v1029_v12 = vunpack.c.l.bf16 %v1028_v6  ;;  %v1170_v18 = vld [vmem:[%s1664_s0 + $0x80] sm:$0xff]   ;;  %v1171_v33 = vld [vmem:[%s1664_s0 + $0x88] sm:$0xff]  }
   0x5   :  { %v193_v8 = vsel %vm144_vm0, %v1061_v3, 0.0  ;;  %290 = vadd.xlane.f32.xlu1 %v289_v7  ;;  %v196_v10 = vsel %vm144_vm0, %v1062_v5, 0.0  ;;  %v202_v19 = vsel %vm144_vm0, %v1066_v14, 0.0  ;;  %v199_v20 = vsel %vm144_vm0, %v1065_v15, 0.0 }
   0x6   :  { %194 = vadd.xlane.f32.xlu0 %v193_v8  ;;  %v148_v16 = vsel %vm144_vm0, %v1030_v11, 0.0  ;;  %v145_v17 = vsel %vm144_vm0, %v1029_v12, 0.0  ;;  %v1094_v21 = vunpack.c.h.bf16 %v1170_v18  ;;  %v1093_v22 = vunpack.c.l.bf16 %v1170_v18 }
   0x7   :  { %v298_v29 = vsel %vm144_vm0, %v1130_v26, 0.0  ;;  %v295_v30 = vsel %vm144_vm0, %v1129_v27, 0.0  ;;  %v1034_v31 = vunpack.c.h.bf16 %v1155_v28  ;;  %v1033_v32 = vunpack.c.l.bf16 %v1155_v28 }
   0x8   :  { %v244_v24 = vsel %vm144_vm0, %v1094_v21, 0.0  ;;  %v241_v25 = vsel %vm144_vm0, %v1093_v22, 0.0  ;;  %v1098_v37 = vunpack.c.h.bf16 %v1171_v33  ;;  %v1097_v38 = vunpack.c.l.bf16 %v1171_v33 }
   0x9   :  { %293 = vadd.xlane.f32.xlu1 %v292_v9  ;;  %v154_v34 = vsel %vm144_vm0, %v1034_v31, 0.0  ;;  %v151_v35 = vsel %vm144_vm0, %v1033_v32, 0.0  ;;  %v1070_v41 = vunpack.c.h.bf16 %v1164_v36  ;;  %v1069_v42 = vunpack.c.l.bf16 %v1164_v36 }
   0xa   :  { %197 = vadd.xlane.f32.xlu0 %v196_v10  ;;  %v250_v39 = vsel %vm144_vm0, %v1098_v37, 0.0  ;;  %v247_v40 = vsel %vm144_vm0, %v1097_v38, 0.0 }
   0xd   :  { %149 = vadd.xlane.f32.xlu1 %v148_v16 }
   0xe   :  { %146 = vadd.xlane.f32.xlu0 %v145_v17 }
  0x11   :  { %203 = vadd.xlane.f32.xlu1 %v202_v19 }
  0x12   :  { %200 = vadd.xlane.f32.xlu0 %v199_v20 }
  0x15   :  { %245 = vadd.xlane.f32.xlu1 %v244_v24 }
  0x16   :  { %242 = vadd.xlane.f32.xlu0 %v241_v25 }
  0x19   :  { %299 = vadd.xlane.f32.xlu1 %v298_v29 }
  0x1a   :  { %296 = vadd.xlane.f32.xlu0 %v295_v30 }
  0x1d   :  { %155 = vadd.xlane.f32.xlu1 %v154_v34 }
  0x1e   :  { %152 = vadd.xlane.f32.xlu0 %v151_v35 }
  0x1f   :  { %8 = vsyncpa [#allocation3], 0  ;;  %v1180_v43 = vld [vmem:[%s1664_s0 + $0xd0] sm:$0xff]   ;;  %v208_v44 = vsel %vm144_vm0, %v1070_v41, 0.0  ;;  %v205_v45 = vsel %vm144_vm0, %v1069_v42, 0.0  ;;  %v1165_v58 = vld [vmem:[%s1664_s0 + $0x58] sm:$0xff]  }
  0x20   :  { %v1134_v46 = vunpack.c.h.bf16 %v1180_v43  ;;  %v1133_v47 = vunpack.c.l.bf16 %v1180_v43  ;;  %v1156_v48 = vld [vmem:[%s1664_s0 + $0x10] sm:$0xff]   ;;  %v1074_v61 = vunpack.c.h.bf16 %v1165_v58  ;;  %v1073_v62 = vunpack.c.l.bf16 %v1165_v58  ;;  %v1181_v63 = vld [vmem:[%s1664_s0 + $0xd8] sm:$0xff]   ;;  %v1166_v14 = vld [vmem:[%s1664_s0 + $0x60] sm:$0xff]   ;;  %s1247_s27 = smov [#allocation2]  }
  0x21   :  { %251 = vadd.xlane.f32.xlu1 %v250_v39  ;;  %v1038_v51 = vunpack.c.h.bf16 %v1156_v48  ;;  %v1037_v52 = vunpack.c.l.bf16 %v1156_v48  ;;  %v1172_v53 = vld [vmem:[%s1664_s0 + $0x90] sm:$0xff]   ;;  %v1138_v2 = vunpack.c.h.bf16 %v1181_v63  ;;  %v1137_v3 = vunpack.c.l.bf16 %v1181_v63  ;;  %v1157_v4 = vld [vmem:[%s1664_s0 + $0x18] sm:$0xff]   ;;  %v1182_v19 = vld [vmem:[%s1664_s0 + $0xe0] sm:$0xff]   ;;  %s1002_s28 = sshll.u32 %s1247_s27, 4  ;;  %s1003_s28 = int_to_ptr.vmem [resolvable:$true] %s1002_s28 }
  0x22   :  { %248 = vadd.xlane.f32.xlu0 %v247_v40  ;;  %v304_v49 = vsel %vm144_vm0, %v1134_v46, 0.0  ;;  %v301_v50 = vsel %vm144_vm0, %v1133_v47, 0.0  ;;  %v1102_v56 = vunpack.c.h.bf16 %v1172_v53  ;;  %v1101_v57 = vunpack.c.l.bf16 %v1172_v53  ;;  %v1173_v9 = vld [vmem:[%s1664_s0 + $0x98] sm:$0xff]   ;;  %v1158_v24 = vld [vmem:[%s1664_s0 + $0x20] sm:$0xff]   ;;  %v1167_v34 = vld [vmem:[%s1664_s0 + $0x68] sm:$0xff]   ;;  %s1225_s29 = scalar_lea.vmem %s1003_s28, 32  ;;  %p1230_p1 = scmp.lt.s32.totalorder %s1003_s28, %s1003_s28 }
  0x23   :  { %v160_v54 = vsel %vm144_vm0, %v1038_v51, 0.0  ;;  %v157_v55 = vsel %vm144_vm0, %v1037_v52, 0.0  ;;  %v214_v0 = vsel %vm144_vm0, %v1074_v61, 0.0  ;;  %v211_v1 = vsel %vm144_vm0, %v1073_v62, 0.0  ;;  %v1174_v29 = vld [vmem:[%s1664_s0 + $0xa0] sm:$0xff]   ;;  %v1183_v39 = vld [vmem:[%s1664_s0 + $0xe8] sm:$0xff]   ;;  %p1226_p0 = scmp.ne.s32.totalorder %s1003_s28, %s1225_s29  ;;  %p1231_p2 = scmp.lt.s32.totalorder %s1225_s29, %s1225_s29 }
  0x24   :  { %v256_v59 = vsel %vm144_vm0, %v1102_v56, 0.0  ;;  %v253_v60 = vsel %vm144_vm0, %v1101_v57, 0.0  ;;  %v310_v5 = vsel %vm144_vm0, %v1138_v2, 0.0  ;;  %v307_v6 = vsel %vm144_vm0, %v1137_v3, 0.0 }
  0x25   :  { %209 = vadd.xlane.f32.xlu1 %v208_v44  ;;  %v1042_v7 = vunpack.c.h.bf16 %v1157_v4  ;;  %v1041_v8 = vunpack.c.l.bf16 %v1157_v4  ;;  %v1106_v12 = vunpack.c.h.bf16 %v1173_v9  ;;  %v1105_v13 = vunpack.c.l.bf16 %v1173_v9  ;;  %v1159_v44 = vld [vmem:[%s1664_s0 + $0x28] sm:$0xff]   ;;  %p1232_p3 = por %p1231_p2, %p1230_p1 }
  0x26   :  { %206 = vadd.xlane.f32.xlu0 %v205_v45  ;;  %v1078_v17 = vunpack.c.h.bf16 %v1166_v14  ;;  %v1077_v18 = vunpack.c.l.bf16 %v1166_v14  ;;  %v1142_v22 = vunpack.c.h.bf16 %v1182_v19  ;;  %v1141_v23 = vunpack.c.l.bf16 %v1182_v19 }
  0x27   :  { %v166_v10 = vsel %vm144_vm0, %v1042_v7, 0.0  ;;  %v163_v11 = vsel %vm144_vm0, %v1041_v8, 0.0  ;;  %v262_v15 = vsel %vm144_vm0, %v1106_v12, 0.0  ;;  %v259_v16 = vsel %vm144_vm0, %v1105_v13, 0.0  ;;  %p1233_p4 = pnand %p1232_p3, %p1226_p0 }
  0x28   :  { %v220_v20 = vsel %vm144_vm0, %v1078_v17, 0.0  ;;  %v217_v21 = vsel %vm144_vm0, %v1077_v18, 0.0  ;;  %v316_v25 = vsel %vm144_vm0, %v1142_v22, 0.0  ;;  %v313_v26 = vsel %vm144_vm0, %v1141_v23, 0.0 }
  0x29   :  { %305 = vadd.xlane.f32.xlu1 %v304_v49  ;;  %v1046_v27 = vunpack.c.h.bf16 %v1158_v24  ;;  %v1045_v28 = vunpack.c.l.bf16 %v1158_v24  ;;  %v1110_v32 = vunpack.c.h.bf16 %v1174_v29  ;;  %v1109_v33 = vunpack.c.l.bf16 %v1174_v29  ;;  %v1175_v49 = vld [vmem:[%s1664_s0 + $0xa8] sm:$0xff]  }
  0x2a   :  { %302 = vadd.xlane.f32.xlu0 %v301_v50  ;;  %v1082_v37 = vunpack.c.h.bf16 %v1167_v34  ;;  %v1081_v38 = vunpack.c.l.bf16 %v1167_v34  ;;  %v1146_v42 = vunpack.c.h.bf16 %v1183_v39  ;;  %v1145_v43 = vunpack.c.l.bf16 %v1183_v39  ;;  %v1213_v34 = vld [vmem:[%s1665_s1 + $0x68] sm:$0xff]   ;;  %v1216_v39 = vld [vmem:[%s1665_s1 + $0x20] sm:$0xff]  }
  0x2b   :  { %v172_v30 = vsel %vm144_vm0, %v1046_v27, 0.0  ;;  %v169_v31 = vsel %vm144_vm0, %v1045_v28, 0.0  ;;  %v268_v35 = vsel %vm144_vm0, %v1110_v32, 0.0  ;;  %v265_v36 = vsel %vm144_vm0, %v1109_v33, 0.0  ;;  %v1177_v27 = vld [vmem:[%s1664_s0 + $0xb8] sm:$0xff]   ;;  %v1211_v28 = vld [vmem:[%s1665_s1 + $0x70] sm:$0xff]  }
  0x2c   :  { %v226_v40 = vsel %vm144_vm0, %v1082_v37, 0.0  ;;  %v223_v41 = vsel %vm144_vm0, %v1081_v38, 0.0  ;;  %v322_v45 = vsel %vm144_vm0, %v1146_v42, 0.0  ;;  %v319_v46 = vsel %vm144_vm0, %v1145_v43, 0.0  ;;  %v1212_v33 = vld [vmem:[%s1665_s1 + $0x30] sm:$0xff]   ;;  %v1214_v37 = vld [vmem:[%s1665_s1 + $0x28] sm:$0xff]  }
  0x2d   :  { %161 = vadd.xlane.f32.xlu1 %v160_v54  ;;  %v1050_v47 = vunpack.c.h.bf16 %v1159_v44  ;;  %v1049_v48 = vunpack.c.l.bf16 %v1159_v44  ;;  %v1114_v52 = vunpack.c.h.bf16 %v1175_v49  ;;  %v1113_v53 = vunpack.c.l.bf16 %v1175_v49  ;;  %v1168_v54 = vld [vmem:[%s1664_s0 + $0x70] sm:$0xff]   ;;  %v1215_v38 = vld [vmem:[%s1665_s1 + $0x60] sm:$0xff]  }
  0x2e   :  { %158 = vadd.xlane.f32.xlu0 %v157_v55  ;;  %v1086_v57 = vunpack.c.h.bf16 %v1168_v54  ;;  %v1085_v58 = vunpack.c.l.bf16 %v1168_v54  ;;  %v1121_v32 = vunpack.c.l.bf16 %v1177_v27  ;;  %v1219_v42 = vld [vmem:[%s1665_s1 + $0x50] sm:$0xff]   ;;  %v504_v44 = vlaneseq  ;;  %v1223_v49 = vld [vmem:[%s1665_s1 + $0x40] sm:$0xff]  }
  0x2f   :  { %v178_v50 = vsel %vm144_vm0, %v1050_v47, 0.0  ;;  %v175_v51 = vsel %vm144_vm0, %v1049_v48, 0.0  ;;  %v274_v55 = vsel %vm144_vm0, %v1114_v52, 0.0  ;;  %v271_v56 = vsel %vm144_vm0, %v1113_v53, 0.0  ;;  %v1220_v43 = vld [vmem:[%s1665_s1 + $0x10] sm:$0xff]   ;;  %v1222_v48 = vld [vmem:[%s1665_s1 + $0x8] sm:$0xff]  }
  0x30   :  { %v229_v61 = vsel %vm144_vm0, %v1085_v58, 0.0  ;;  %v1478_v54 = vshrl.u32 %v504_v44, 7  ;;  %vm515_vm1 = vcmask 130112   ;;  %vm522_vm2 = vcmask 195712  }
  0x31   :  { %257 = vadd.xlane.f32.xlu1 %v256_v59  ;;  %v1184_v59 = vld [vmem:[%s1664_s0 + $0xf0] sm:$0xff]   ;;  %vm529_vm3 = vcmask 261312   ;;  %vm536_vm4 = vcmask 326912   ;;  %vm543_vm5 = vcmask 392512   ;;  %vm550_vm6 = vcmask 458112  }
  0x32   :  { %254 = vadd.xlane.f32.xlu0 %v253_v60  ;;  %v232_v60 = vsel %vm144_vm0, %v1086_v57, 0.0  ;;  %v1150_v62 = vunpack.c.h.bf16 %v1184_v59  ;;  %v1149_v63 = vunpack.c.l.bf16 %v1184_v59  ;;  %vm557_vm7 = vcmask 523712  }
  0x33   :  { %vm564_vm8 = vcmask 589312   ;;  %vm571_vm9 = vcmask 654912   ;;  %vm578_vm10 = vcmask 720512   ;;  %vm585_vm11 = vcmask 786112  }
  0x34   :  { %v325_v2 = vsel %vm144_vm0, %v1149_v63, 0.0  ;;  %vm592_vm12 = vcmask 851712   ;;  %vm599_vm13 = vcmask 917312   ;;  %vm606_vm14 = vcmask 982912  }
  0x35   :  { %215 = vadd.xlane.f32.xlu1 %v214_v0  ;;  %v1160_v0 = vld [vmem:[%s1664_s0 + $0x30] sm:$0xff]   ;;  %vm613_vm15 = vcmask 1048512  }
  0x36   :  { %212 = vadd.xlane.f32.xlu0 %v211_v1  ;;  %v328_v1 = vsel %vm144_vm0, %v1150_v62, 0.0  ;;  %v1054_v3 = vunpack.c.h.bf16 %v1160_v0  ;;  %v1053_v4 = vunpack.c.l.bf16 %v1160_v0 }
  0x38   :  { %v181_v7 = vsel %vm144_vm0, %v1053_v4, 0.0 }
  0x39   :  { %311 = vadd.xlane.f32.xlu1 %v310_v5  ;;  %v1176_v5 = vld [vmem:[%s1664_s0 + $0xb0] sm:$0xff]  }
  0x3a   :  { %308 = vadd.xlane.f32.xlu0 %v307_v6  ;;  %v184_v6 = vsel %vm144_vm0, %v1054_v3, 0.0  ;;  %v1118_v8 = vunpack.c.h.bf16 %v1176_v5  ;;  %v1117_v9 = vunpack.c.l.bf16 %v1176_v5 }
  0x3c   :  { %v277_v12 = vsel %vm144_vm0, %v1117_v9, 0.0 }
  0x3d   :  { %167 = vadd.xlane.f32.xlu1 %v166_v10  ;;  %v1169_v10 = vld [vmem:[%s1664_s0 + $0x78] sm:$0xff]  }
  0x3e   :  { %164 = vadd.xlane.f32.xlu0 %v163_v11  ;;  %v280_v11 = vsel %vm144_vm0, %v1118_v8, 0.0  ;;  %v1090_v13 = vunpack.c.h.bf16 %v1169_v10  ;;  %v1089_v14 = vunpack.c.l.bf16 %v1169_v10 }
  0x40   :  { %v235_v17 = vsel %vm144_vm0, %v1089_v14, 0.0 }
  0x41   :  { %263 = vadd.xlane.f32.xlu1 %v262_v15  ;;  %v1185_v15 = vld [vmem:[%s1664_s0 + $0xf8] sm:$0xff]  }
  0x42   :  { %260 = vadd.xlane.f32.xlu0 %v259_v16  ;;  %v238_v16 = vsel %vm144_vm0, %v1090_v13, 0.0  ;;  %v1154_v18 = vunpack.c.h.bf16 %v1185_v15  ;;  %v1153_v19 = vunpack.c.l.bf16 %v1185_v15 }
  0x44   :  { %v334_v22 = vsel %vm144_vm0, %v1154_v18, 0.0  ;;  %v331_v23 = vsel %vm144_vm0, %v1153_v19, 0.0 }
  0x45   :  { %221 = vadd.xlane.f32.xlu1 %v220_v20  ;;  %v1161_v20 = vld [vmem:[%s1664_s0 + $0x38] sm:$0xff]  }
  0x46   :  { %218 = vadd.xlane.f32.xlu0 %v217_v21  ;;  %v1209_v21 = vld [vmem:[%s1665_s1 + $0x78] sm:$0xff]   ;;  %v1058_v24 = vunpack.c.h.bf16 %v1161_v20 }
  0x47   :  { %1186 = vmatprep.subr.bf16.mxu0 %v1209_v21 }
  0x48   :  { %v190_v29 = vsel %vm144_vm0, %v1058_v24, 0.0 }
  0x49   :  { %317 = vadd.xlane.f32.xlu1 %v316_v25  ;;  %v1057_v25 = vunpack.c.l.bf16 %v1161_v20 }
  0x4a   :  { %314 = vadd.xlane.f32.xlu0 %v313_v26  ;;  %v1210_v26 = vld [vmem:[%s1665_s1 + $0x38] sm:$0xff]  }
  0x4b   :  { %1187 = vmatpush3.bf16.msra.mxu0 %v1210_v26 }
  0x4c   :  { %1188 = vmatprep.subr.bf16.mxu0 %v1211_v28 }
  0x4d   :  { %173 = vadd.xlane.f32.xlu1 %v172_v30  ;;  %v187_v30 = vsel %vm144_vm0, %v1057_v25, 0.0 }
  0x4e   :  { %170 = vadd.xlane.f32.xlu0 %v169_v31  ;;  %v1122_v31 = vunpack.c.h.bf16 %v1177_v27 }
  0x4f   :  { %1189 = vmatpush3.bf16.msra.mxu0 %v1212_v33 }
  0x50   :  { %1190 = vmatprep.subr.bf16.mxu0 %v1213_v34 }
  0x51   :  { %269 = vadd.xlane.f32.xlu1 %v268_v35  ;;  %v286_v35 = vsel %vm144_vm0, %v1122_v31, 0.0 }
  0x52   :  { %266 = vadd.xlane.f32.xlu0 %v265_v36  ;;  %v283_v36 = vsel %vm144_vm0, %v1121_v32, 0.0  ;;  %vm852_vm0 = vcmask 1041409  }
  0x53   :  { %1191 = vmatpush3.bf16.msra.mxu0 %v1214_v37 }
  0x54   :  { %1192 = vmatprep.subr.bf16.mxu0 %v1215_v38 }
  0x55   :  { %227 = vadd.xlane.f32.xlu1 %v226_v40  ;;  %v1217_v40 = vld [vmem:[%s1665_s1 + $0x58] sm:$0xff]  }
  0x56   :  { %224 = vadd.xlane.f32.xlu0 %v223_v41  ;;  %v1218_v41 = vld [vmem:[%s1665_s1 + $0x18] sm:$0xff]  }
  0x57   :  { %1193 = vmatpush3.bf16.msra.mxu0 %v1216_v39 }
  0x58   :  { %1194 = vmatprep.subr.bf16.mxu0 %v1217_v40 }
  0x59   :  { %323 = vadd.xlane.f32.xlu1 %v322_v45  ;;  %v1221_v45 = vld [vmem:[%s1665_s1 + $0x48] sm:$0xff]  }
  0x5a   :  { %320 = vadd.xlane.f32.xlu0 %v319_v46 }
  0x5b   :  { %1195 = vmatpush3.bf16.msra.mxu0 %v1218_v41 }
  0x5c   :  { %1196 = vmatprep.subr.bf16.mxu0 %v1219_v42 }
  0x5d   :  { %179 = vadd.xlane.f32.xlu1 %v178_v50  ;;  %v1473_v50 = vand.u32 127, %v504_v44 }
  0x5e   :  { %176 = vadd.xlane.f32.xlu0 %v175_v51  ;;  %v1224_v51 = vld [vmem:[%s1665_s1] sm:$0xff]  }
  0x5f   :  { %1197 = vmatpush3.bf16.msra.mxu0 %v1220_v43  ;;  %v510_v57 = vadd.s32 4294967288, %v1473_v50  ;;  %v524_v62 = vadd.s32 4294967272, %v1473_v50 }
  0x60   :  { %1198 = vmatprep.subr.bf16.mxu0 %v1221_v45 }
  0x61   :  { %275 = vadd.xlane.f32.xlu1 %v274_v55  ;;  %v513_v63 = vsub.s32 %v510_v57, %v1478_v54 }
  0x62   :  { %272 = vadd.xlane.f32.xlu0 %v271_v56 }
  0x63   :  { %1199 = vmatpush3.bf16.msra.mxu0 %v1222_v48 }
  0x64   :  { %1200 = vmatprep.subr.bf16.mxu0 %v1223_v49 }
  0x65   :  { %233 = vadd.xlane.f32.xlu1 %v232_v60  ;;  %v508_v60 = vsub.s32 %v1473_v50, %v1478_v54 }
  0x66   :  { %230 = vadd.xlane.f32.xlu0 %v229_v61  ;;  %v517_v61 = vadd.s32 4294967280, %v1473_v50 }
  0x67   :  { %1201 = vmatpush3.bf16.msra.mxu0 %v1224_v51 }
  0x68   :  { %v520_v5 = vsub.s32 %v517_v61, %v1478_v54 }
  0x69   :  { %329 = vadd.xlane.f32.xlu1 %v328_v1 }
  0x6a   :  { %326 = vadd.xlane.f32.xlu0 %v325_v2 }
  0x6d   :  { %185 = vadd.xlane.f32.xlu1 %v184_v6  ;;  %v527_v6 = vsub.s32 %v524_v62, %v1478_v54 }
  0x6e   :  { %182 = vadd.xlane.f32.xlu0 %v181_v7 }
  0x71   :  { %281 = vadd.xlane.f32.xlu1 %v280_v11 }
  0x72   :  { %278 = vadd.xlane.f32.xlu0 %v277_v12 }
  0x75   :  { %239 = vadd.xlane.f32.xlu1 %v238_v16 }
  0x76   :  { %236 = vadd.xlane.f32.xlu0 %v235_v17 }
  0x79   :  { %335 = vadd.xlane.f32.xlu1 %v334_v22 }
  0x7a   :  { %332 = vadd.xlane.f32.xlu0 %v331_v23 }
  0x7d   :  { %191 = vadd.xlane.f32.xlu1 %v190_v29 }
  0x7e   :  { %188 = vadd.xlane.f32.xlu0 %v187_v30 }
  0x81   :  { %287 = vadd.xlane.f32.xlu1 %v286_v35 }
  0x82   :  { %284 = vadd.xlane.f32.xlu0 %v283_v36 }
  0x8e   :  { %v291_v46 = vpop.xlane.xlu1 %290 }
  0x8f   :  { %v195_v47 = vpop.xlane.xlu0 %194 }
  0x92   :  { %v294_v52 = vpop.xlane.xlu1 %293 }
  0x93   :  { %v198_v53 = vpop.xlane.xlu0 %197  ;;  %v361_v55 = vpack.c.bf16 %v294_v52, %v291_v46  ;;  %v538_v52 = vadd.s32 4294967256, %v1473_v50 }
  0x94   :  { %v345_v56 = vpack.c.bf16 %v198_v53, %v195_v47  ;;  %v531_v47 = vadd.s32 4294967264, %v1473_v50 }
  0x95   :  { %v488_v12 = vunpack.c.l.b16 %v361_v55  ;;  %v489_v15 = vunpack.c.h.b16 %v361_v55 }
  0x96   :  { %v150_v58 = vpop.xlane.xlu1 %149  ;;  %v456_v0 = vunpack.c.l.b16 %v345_v56  ;;  %v457_v1 = vunpack.c.h.b16 %v345_v56 }
  0x97   :  { %v147_v59 = vpop.xlane.xlu0 %146  ;;  %v776_v24 = vrot.slane %v488_v12, %v508_v60  ;;  %v780_v25 = vrot.slane %v489_v15, %v513_v63 }
  0x98   :  { %v337_v2 = vpack.c.bf16 %v150_v58, %v147_v59  ;;  %v618_v8 = vrot.slane %v456_v0, %v508_v60  ;;  %v622_v9 = vrot.slane %v457_v1, %v513_v63  ;;  %v534_v0 = vsub.s32 %v531_v47, %v1478_v54 }
  0x99   :  { %v781_v33 = vsel %vm515_vm1, %v780_v25, %v776_v24 }
  0x9a   :  { %v204_v3 = vpop.xlane.xlu1 %203  ;;  %v623_v19 = vsel %vm515_vm1, %v622_v9, %v618_v8  ;;  %v440_v27 = vunpack.c.l.b16 %v337_v2  ;;  %v441_v28 = vunpack.c.h.b16 %v337_v2 }
  0x9b   :  { %v201_v4 = vpop.xlane.xlu0 %200 }
  0x9c   :  { %v346_v7 = vpack.c.bf16 %v204_v3, %v201_v4  ;;  %v509_v37 = vrot.slane %v440_v27, %v508_v60  ;;  %v514_v38 = vrot.slane %v441_v28, %v513_v63  ;;  %v541_v4 = vsub.s32 %v538_v52, %v1478_v54 }
  0x9e   :  { %v458_v10 = vunpack.c.l.b16 %v346_v7  ;;  %v459_v11 = vunpack.c.h.b16 %v346_v7  ;;  %v246_v13 = vpop.xlane.xlu1 %245  ;;  %v516_v53 = vsel %vm515_vm1, %v514_v38, %v509_v37 }
  0x9f   :  { %v243_v14 = vpop.xlane.xlu0 %242 }
  0xa0   :  { %v627_v16 = vrot.slane %v458_v10, %v520_v5  ;;  %v632_v17 = vrot.slane %v459_v11, %v527_v6  ;;  %v353_v18 = vpack.c.bf16 %v246_v13, %v243_v14 }
  0xa2   :  { %v628_v20 = vsel %vm522_vm2, %v627_v16, %v623_v19  ;;  %v300_v22 = vpop.xlane.xlu1 %299  ;;  %v472_v39 = vunpack.c.l.b16 %v353_v18  ;;  %v473_v40 = vunpack.c.h.b16 %v353_v18 }
  0xa3   :  { %v633_v21 = vsel %vm529_vm3, %v632_v17, %v628_v20  ;;  %v297_v23 = vpop.xlane.xlu0 %296 }
  0xa4   :  { %v362_v26 = vpack.c.bf16 %v300_v22, %v297_v23  ;;  %v697_v55 = vrot.slane %v472_v39, %v508_v60  ;;  %v701_v56 = vrot.slane %v473_v40, %v513_v63 }
  0xa6   :  { %v490_v29 = vunpack.c.l.b16 %v362_v26  ;;  %v491_v30 = vunpack.c.h.b16 %v362_v26  ;;  %v156_v31 = vpop.xlane.xlu1 %155  ;;  %v702_v8 = vsel %vm515_vm1, %v701_v56, %v697_v55 }
  0xa7   :  { %v153_v32 = vpop.xlane.xlu0 %152 }
  0xa8   :  { %v785_v34 = vrot.slane %v490_v29, %v520_v5  ;;  %v790_v35 = vrot.slane %v491_v30, %v527_v6  ;;  %v338_v36 = vpack.c.bf16 %v156_v31, %v153_v32 }
  0xaa   :  { %v786_v41 = vsel %vm522_vm2, %v785_v34, %v781_v33  ;;  %v442_v42 = vunpack.c.l.b16 %v338_v36  ;;  %v443_v43 = vunpack.c.h.b16 %v338_v36  ;;  %v252_v45 = vpop.xlane.xlu1 %251 }
  0xab   :  { %v791_v44 = vsel %vm529_vm3, %v790_v35, %v786_v41  ;;  %v249_v46 = vpop.xlane.xlu0 %248 }
  0xac   :  { %v521_v48 = vrot.slane %v442_v42, %v520_v5  ;;  %v528_v49 = vrot.slane %v443_v43, %v527_v6  ;;  %v354_v51 = vpack.c.bf16 %v252_v45, %v249_v46 }
  0xae   :  { %v523_v57 = vsel %vm522_vm2, %v521_v48, %v516_v53  ;;  %v474_v58 = vunpack.c.l.b16 %v354_v51  ;;  %v475_v59 = vunpack.c.h.b16 %v354_v51  ;;  %v210_v62 = vpop.xlane.xlu1 %209 }
  0xaf   :  { %v530_v61 = vsel %vm529_vm3, %v528_v49, %v523_v57  ;;  %v207_v1 = vpop.xlane.xlu0 %206 }
  0xb0   :  { %v706_v2 = vrot.slane %v474_v58, %v520_v5  ;;  %v711_v3 = vrot.slane %v475_v59, %v527_v6  ;;  %v347_v7 = vpack.c.bf16 %v210_v62, %v207_v1 }
  0xb2   :  { %v707_v60 = vsel %vm522_vm2, %v706_v2, %v702_v8  ;;  %v460_v63 = vunpack.c.l.b16 %v347_v7  ;;  %v461_v9 = vunpack.c.h.b16 %v347_v7  ;;  %v306_v11 = vpop.xlane.xlu1 %305  ;;  %v552_v2 = vadd.s32 4294967240, %v1473_v50 }
  0xb3   :  { %v712_v10 = vsel %vm529_vm3, %v711_v3, %v707_v60  ;;  %v303_v12 = vpop.xlane.xlu0 %302  ;;  %v559_v60 = vadd.s32 4294967232, %v1473_v50 }
  0xb4   :  { %v637_v13 = vrot.slane %v460_v63, %v534_v0  ;;  %v642_v14 = vrot.slane %v461_v9, %v541_v4  ;;  %v363_v15 = vpack.c.bf16 %v306_v11, %v303_v12 }
  0xb6   :  { %v638_v5 = vsel %vm536_vm4, %v637_v13, %v633_v21  ;;  %v492_v6 = vunpack.c.l.b16 %v363_v15  ;;  %v493_v16 = vunpack.c.h.b16 %v363_v15  ;;  %v162_v18 = vpop.xlane.xlu1 %161  ;;  %v566_v13 = vadd.s32 4294967224, %v1473_v50 }
  0xb7   :  { %v1506_v17 = vsel %vm543_vm5, %v642_v14, %v638_v5  ;;  %v159_v19 = vpop.xlane.xlu0 %158  ;;  %v573_v15 = vadd.s32 4294967216, %v1473_v50  ;;  %v580_v5 = vadd.s32 4294967208, %v1473_v50 }
  0xb8   :  { %v795_v20 = vrot.slane %v492_v6, %v534_v0  ;;  %v800_v22 = vrot.slane %v493_v16, %v541_v4  ;;  %v339_v23 = vpack.c.bf16 %v162_v18, %v159_v19  ;;  %v1543_v18 = vsub.s32 %v559_v60, %v1478_v54 }
  0xba   :  { %v796_v24 = vsel %vm536_vm4, %v795_v20, %v791_v44  ;;  %v444_v25 = vunpack.c.l.b16 %v339_v23  ;;  %v445_v26 = vunpack.c.h.b16 %v339_v23  ;;  %v258_v28 = vpop.xlane.xlu1 %257  ;;  %v587_v20 = vadd.s32 4294967200, %v1473_v50 }
  0xbb   :  { %v1510_v27 = vsel %vm543_vm5, %v800_v22, %v796_v24  ;;  %v255_v29 = vpop.xlane.xlu0 %254  ;;  %v594_v22 = vadd.s32 4294967192, %v1473_v50 }
  0xbc   :  { %v535_v21 = vrot.slane %v444_v25, %v534_v0  ;;  %v542_v30 = vrot.slane %v445_v26, %v541_v4  ;;  %v355_v31 = vpack.c.bf16 %v258_v28, %v255_v29 }
  0xbe   :  { %v537_v32 = vsel %vm536_vm4, %v535_v21, %v530_v61  ;;  %v476_v33 = vunpack.c.l.b16 %v355_v31  ;;  %v477_v34 = vunpack.c.h.b16 %v355_v31  ;;  %v216_v36 = vpop.xlane.xlu1 %215 }
  0xbf   :  { %v1514_v35 = vsel %vm543_vm5, %v542_v30, %v537_v32  ;;  %v213_v37 = vpop.xlane.xlu0 %212  ;;  %v1548_v30 = vsub.s32 %v566_v13, %v1478_v54 }
  0xc0   :  { %v716_v38 = vrot.slane %v476_v33, %v534_v0  ;;  %v721_v39 = vrot.slane %v477_v34, %v541_v4  ;;  %v545_v0 = vadd.s32 4294967248, %v1473_v50  ;;  %v348_v1 = vpack.c.bf16 %v216_v36, %v213_v37 }
  0xc1   :  { %v1551_v33 = vsub.s32 %v573_v15, %v1478_v54  ;;  %v1554_v34 = vsub.s32 %v580_v5, %v1478_v54 }
  0xc2   :  { %v717_v40 = vsel %vm536_vm4, %v716_v38, %v712_v10  ;;  %v312_v42 = vpop.xlane.xlu1 %311  ;;  %v548_v63 = vsub.s32 %v545_v0, %v1478_v54  ;;  %v462_v9 = vunpack.c.l.b16 %v348_v1  ;;  %v1533_v10 = vsub.s32 %v552_v2, %v1478_v54 }
  0xc3   :  { %v1518_v41 = vsel %vm543_vm5, %v721_v39, %v717_v40  ;;  %v309_v43 = vpop.xlane.xlu0 %308  ;;  %v463_v23 = vunpack.c.h.b16 %v348_v1  ;;  %v1557_v39 = vsub.s32 %v587_v20, %v1478_v54  ;;  %v1560_v40 = vsub.s32 %v594_v22, %v1478_v54 }
  0xc4   :  { %v364_v3 = vpack.c.bf16 %v312_v42, %v309_v43  ;;  %v647_v24 = vrot.slane %v462_v9, %v548_v63  ;;  %v601_v42 = vadd.s32 4294967184, %v1473_v50 }
  0xc6   :  { %v168_v44 = vpop.xlane.xlu1 %167  ;;  %v494_v11 = vunpack.c.l.b16 %v364_v3  ;;  %v495_v25 = vunpack.c.h.b16 %v364_v3  ;;  %v648_v43 = vsel %vm550_vm6, %v647_v24, %v1506_v17 }
  0xc7   :  { %v165_v45 = vpop.xlane.xlu0 %164 }
  0xc8   :  { %v340_v4 = vpack.c.bf16 %v168_v44, %v165_v45  ;;  %v805_v28 = vrot.slane %v494_v11, %v548_v63  ;;  %v652_v44 = vrot.slane %v463_v23, %v1533_v10  ;;  %v810_v45 = vrot.slane %v495_v25, %v1533_v10 }
  0xca   :  { %v264_v46 = vpop.xlane.xlu1 %263  ;;  %v446_v12 = vunpack.c.l.b16 %v340_v4  ;;  %v447_v29 = vunpack.c.h.b16 %v340_v4 }
  0xcb   :  { %v261_v47 = vpop.xlane.xlu0 %260 }
  0xcc   :  { %v356_v14 = vpack.c.bf16 %v264_v46, %v261_v47  ;;  %v549_v21 = vrot.slane %v446_v12, %v548_v63  ;;  %v806_v47 = vsel %vm550_vm6, %v805_v28, %v1510_v27  ;;  %v608_v27 = vadd.s32 4294967176, %v1473_v50 }
  0xce   :  { %v222_v48 = vpop.xlane.xlu1 %221  ;;  %v478_v31 = vunpack.c.l.b16 %v356_v14 }
  0xcf   :  { %v219_v49 = vpop.xlane.xlu0 %218 }
  0xd0   :  { %v349_v19 = vpack.c.bf16 %v222_v48, %v219_v49  ;;  %v551_v48 = vsel %vm550_vm6, %v549_v21, %v1514_v35  ;;  %v556_v49 = vrot.slane %v447_v29, %v1533_v10  ;;  %v653_v35 = vsel %vm557_vm7, %v652_v44, %v648_v43 }
  0xd2   :  { %v318_v51 = vpop.xlane.xlu1 %317  ;;  %v464_v38 = vunpack.c.l.b16 %v349_v19  ;;  %v465_v2 = vunpack.c.h.b16 %v349_v19 }
  0xd3   :  { %v315_v52 = vpop.xlane.xlu0 %314 }
  0xd4   :  { %v365_v26 = vpack.c.bf16 %v318_v51, %v315_v52  ;;  %v479_v52 = vunpack.c.h.b16 %v356_v14  ;;  %v657_v3 = vrot.slane %v464_v38, %v1543_v18  ;;  %v662_v15 = vrot.slane %v465_v2, %v1548_v30 }
  0xd6   :  { %v174_v53 = vpop.xlane.xlu1 %173  ;;  %v496_v46 = vunpack.c.l.b16 %v365_v26  ;;  %v497_v60 = vunpack.c.h.b16 %v365_v26  ;;  %v658_v14 = vsel %vm564_vm8, %v657_v3, %v653_v35 }
  0xd7   :  { %v171_v55 = vpop.xlane.xlu0 %170 }
  0xd8   :  { %v341_v32 = vpack.c.bf16 %v174_v53, %v171_v55  ;;  %v726_v53 = vrot.slane %v478_v31, %v548_v63  ;;  %v820_v22 = vrot.slane %v497_v60, %v1548_v30 }
  0xda   :  { %v270_v56 = vpop.xlane.xlu1 %269  ;;  %v448_v55 = vunpack.c.l.b16 %v341_v32  ;;  %v449_v63 = vunpack.c.h.b16 %v341_v32  ;;  %v727_v11 = vsel %vm550_vm6, %v726_v53, %v1518_v41 }
  0xdb   :  { %v267_v57 = vpop.xlane.xlu0 %266 }
  0xdc   :  { %v357_v51 = vpack.c.bf16 %v270_v56, %v267_v57  ;;  %v815_v56 = vrot.slane %v496_v46, %v1543_v18  ;;  %v1579_v57 = vsub.s32 %v601_v42, %v1478_v54  ;;  %v563_v50 = vrot.slane %v448_v55, %v1543_v18 }
  0xde   :  { %v228_v58 = vpop.xlane.xlu1 %227  ;;  %v480_v9 = vunpack.c.l.b16 %v357_v51  ;;  %v481_v23 = vunpack.c.h.b16 %v357_v51 }
  0xdf   :  { %v225_v59 = vpop.xlane.xlu0 %224 }
  0xe0   :  { %v350_v0 = vpack.c.bf16 %v228_v58, %v225_v59  ;;  %v811_v58 = vsel %vm557_vm7, %v810_v45, %v806_v47  ;;  %v558_v59 = vsel %vm557_vm7, %v556_v49, %v551_v48  ;;  %v736_v24 = vrot.slane %v480_v9, %v1543_v18 }
  0xe1   :  { %v816_v20 = vsel %vm564_vm8, %v815_v56, %v811_v58  ;;  %v565_v28 = vsel %vm564_vm8, %v563_v50, %v558_v59  ;;  %v741_v42 = vrot.slane %v481_v23, %v1548_v30 }
  0xe2   :  { %v1520_v61 = vpop.xlane.xlu1 %323  ;;  %v467_v25 = vunpack.c.h.b16 %v350_v0  ;;  %v821_v18 = vsel %vm571_vm9, %v820_v22, %v816_v20 }
  0xe3   :  { %v1522_v62 = vpop.xlane.xlu0 %320 }
  0xe4   :  { %v366_v4 = vpack.c.bf16 %v1520_v61, %v1522_v62  ;;  %v731_v61 = vrot.slane %v479_v52, %v1533_v10  ;;  %v466_v62 = vunpack.c.l.b16 %v350_v0  ;;  %v570_v10 = vrot.slane %v449_v63, %v1548_v30 }
  0xe5   :  { %v672_v46 = vrot.slane %v467_v25, %v1554_v34 }
  0xe6   :  { %v1526_v7 = vpop.xlane.xlu1 %179  ;;  %v498_v5 = vunpack.c.l.b16 %v366_v4  ;;  %v667_v29 = vrot.slane %v466_v62, %v1551_v33  ;;  %v499_v21 = vunpack.c.h.b16 %v366_v4 }
  0xe7   :  { %v1528_v8 = vpop.xlane.xlu0 %176 }
  0xe8   :  { %v342_v41 = vpack.c.bf16 %v1526_v7, %v1528_v8  ;;  %v663_v7 = vsel %vm571_vm9, %v662_v15, %v658_v14  ;;  %v825_v8 = vrot.slane %v498_v5, %v1551_v33  ;;  %v830_v49 = vrot.slane %v499_v21, %v1554_v34 }
  0xe9   :  { %v668_v48 = vsel %vm578_vm10, %v667_v29, %v663_v7 }
  0xea   :  { %v1538_v6 = vpop.xlane.xlu1 %275  ;;  %v450_v43 = vunpack.c.l.b16 %v342_v41  ;;  %v826_v55 = vsel %vm578_vm10, %v825_v8, %v821_v18  ;;  %v451_v0 = vunpack.c.h.b16 %v342_v41  ;;  %v673_v4 = vsel %vm585_vm11, %v672_v46, %v668_v48 }
  0xeb   :  { %v1540_v16 = vpop.xlane.xlu0 %272  ;;  %v831_v56 = vsel %vm585_vm11, %v830_v49, %v826_v55 }
  0xec   :  { %v358_v44 = vpack.c.bf16 %v1538_v6, %v1540_v16 }
  0xee   :  { %v234_v36 = vpop.xlane.xlu1 %233  ;;  %v482_v2 = vunpack.c.l.b16 %v358_v44  ;;  %v483_v14 = vunpack.c.h.b16 %v358_v44 }
  0xef   :  { %v231_v37 = vpop.xlane.xlu0 %230 }
  0xf0   :  { %v351_v19 = vpack.c.bf16 %v234_v36, %v231_v37  ;;  %v1598_v36 = vsub.s32 %v608_v27, %v1478_v54  ;;  %v732_v37 = vsel %vm557_vm7, %v731_v61, %v727_v11  ;;  %v572_v54 = vsel %vm571_vm9, %v570_v10, %v565_v28 }
  0xf1   :  { %v737_v45 = vsel %vm564_vm8, %v736_v24, %v732_v37  ;;  %v584_v61 = vrot.slane %v451_v0, %v1554_v34  ;;  %v746_v15 = vrot.slane %v482_v2, %v1551_v33  ;;  %v751_v37 = vrot.slane %v483_v14, %v1554_v34 }
  0xf2   :  { %v330_v17 = vpop.xlane.xlu1 %329  ;;  %v468_v38 = vunpack.c.l.b16 %v351_v19  ;;  %v469_v51 = vunpack.c.h.b16 %v351_v19 }
  0xf3   :  { %v327_v1 = vpop.xlane.xlu0 %326 }
  0xf4   :  { %v367_v26 = vpack.c.bf16 %v330_v17, %v327_v1  ;;  %v677_v6 = vrot.slane %v468_v38, %v1557_v39  ;;  %v742_v17 = vsel %vm571_vm9, %v741_v42, %v737_v45  ;;  %v577_v1 = vrot.slane %v450_v43, %v1551_v33 }
  0xf5   :  { %v682_v58 = vrot.slane %v469_v51, %v1560_v40  ;;  %v747_v38 = vsel %vm578_vm10, %v746_v15, %v742_v17 }
  0xf6   :  { %v186_v12 = vpop.xlane.xlu1 %185  ;;  %v500_v47 = vunpack.c.l.b16 %v367_v26  ;;  %v501_v3 = vunpack.c.h.b16 %v367_v26  ;;  %v678_v50 = vsel %vm592_vm12, %v677_v6, %v673_v4 }
  0xf7   :  { %v183_v13 = vpop.xlane.xlu0 %182  ;;  %v683_v28 = vsel %vm599_vm13, %v682_v58, %v678_v50 }
  0xf8   :  { %v343_v52 = vpack.c.bf16 %v186_v12, %v183_v13  ;;  %v835_v27 = vrot.slane %v500_v47, %v1557_v39  ;;  %v579_v13 = vsel %vm578_vm10, %v577_v1, %v572_v54  ;;  %v840_v5 = vrot.slane %v501_v3, %v1560_v40 }
  0xfa   :  { %v282_v31 = vpop.xlane.xlu1 %281  ;;  %v452_v59 = vunpack.c.l.b16 %v343_v52  ;;  %v836_v19 = vsel %vm592_vm12, %v835_v27, %v831_v56  ;;  %v453_v41 = vunpack.c.h.b16 %v343_v52 }
  0xfb   :  { %v279_v32 = vpop.xlane.xlu0 %278  ;;  %v841_v8 = vsel %vm599_vm13, %v840_v5, %v836_v19 }
  0xfc   :  { %v359_v35 = vpack.c.bf16 %v282_v31, %v279_v32  ;;  %v591_v10 = vrot.slane %v452_v59, %v1557_v39  ;;  %v586_v32 = vsel %vm585_vm11, %v584_v61, %v579_v13  ;;  %v598_v44 = vrot.slane %v453_v41, %v1560_v40 }
  0xfe   :  { %v240_v53 = vpop.xlane.xlu1 %239  ;;  %v484_v20 = vunpack.c.l.b16 %v359_v35  ;;  %v485_v7 = vunpack.c.h.b16 %v359_v35  ;;  %v593_v34 = vsel %vm592_vm12, %v591_v10, %v586_v32 }
  0xff   :  { %v237_v30 = vpop.xlane.xlu0 %236 }
 0x100   :  { %v352_v16 = vpack.c.bf16 %v240_v53, %v237_v30  ;;  %v756_v18 = vrot.slane %v484_v20, %v1557_v39  ;;  %v752_v39 = vsel %vm585_vm11, %v751_v37, %v747_v38  ;;  %v761_v53 = vrot.slane %v485_v7, %v1560_v40 }
 0x102   :  { %v470_v60 = vunpack.c.l.b16 %v352_v16  ;;  %v471_v63 = vunpack.c.h.b16 %v352_v16  ;;  %v336_v9 = vpop.xlane.xlu1 %335  ;;  %v757_v55 = vsel %vm592_vm12, %v756_v18, %v752_v39  ;;  %v600_v16 = vsel %vm599_vm13, %v598_v44, %v593_v34 }
 0x103   :  { %v333_v11 = vpop.xlane.xlu0 %332  ;;  %v762_v4 = vsel %vm599_vm13, %v761_v53, %v757_v55 }
 0x104   :  { %v687_v62 = vrot.slane %v470_v60, %v1579_v57  ;;  %v368_v12 = vpack.c.bf16 %v336_v9, %v333_v11  ;;  %v692_v24 = vrot.slane %v471_v63, %v1598_v36 }
 0x106   :  { %v502_v22 = vunpack.c.l.b16 %v368_v12  ;;  %v503_v23 = vunpack.c.h.b16 %v368_v12  ;;  %v192_v25 = vpop.xlane.xlu1 %191  ;;  %v688_v31 = vsel %vm606_vm14, %v687_v62, %v683_v28 }
 0x107   :  { %v189_v26 = vpop.xlane.xlu0 %188  ;;  %v693_v47 = vsel %vm613_vm15, %v692_v24, %v688_v31 }
 0x108   :  { %v845_v29 = vrot.slane %v502_v22, %v1579_v57  ;;  %v850_v33 = vrot.slane %v503_v23, %v1598_v36  ;;  %v344_v21 = vpack.c.bf16 %v192_v25, %v189_v26 }
 0x10a   :  { %v454_v42 = vunpack.c.l.b16 %v344_v21  ;;  %v846_v43 = vsel %vm606_vm14, %v845_v29, %v841_v8  ;;  %v455_v54 = vunpack.c.h.b16 %v344_v21  ;;  %v288_v45 = vpop.xlane.xlu1 %287 }
 0x10b   :  { %v285_v46 = vpop.xlane.xlu0 %284  ;;  %v851_v48 = vsel %vm613_vm15, %v850_v33, %v846_v43 }
 0x10c   :  { %v605_v49 = vrot.slane %v454_v42, %v1579_v57  ;;  %v360_v51 = vpack.c.bf16 %v288_v45, %v285_v46  ;;  %v854_v52 = vsel %vm852_vm0, %v851_v48, %v693_v47  ;;  %v612_v17 = vrot.slane %v455_v54, %v1598_v36 }
 0x10d   :  { %v856_v30 = vpack.c.b16 %v854_v52, %v854_v52 }
 0x10e   :  { %v486_v0 = vunpack.c.l.b16 %v360_v51  ;;  %v487_v6 = vunpack.c.h.b16 %v360_v51  ;;  %v607_v3 = vsel %vm606_vm14, %v605_v49, %v600_v16 }
 0x10f   :  { %987 = vmatprep.mubr.bf16.mxu0 %v856_v30  ;;  %v614_v27 = vsel %vm613_vm15, %v612_v17, %v607_v3 }
 0x110   :  { %v766_v1 = vrot.slane %v486_v0, %v1579_v57  ;;  %v771_v2 = vrot.slane %v487_v6, %v1598_v36  ;;  %v1010_v57 = vld [vmem:[%s1666_s2] ss:$0 sm:$0xff] }
 0x112   :  { %v767_v40 = vsel %vm606_vm14, %v766_v1, %v762_v4 }
 0x113   :  { %v772_v35 = vsel %vm613_vm15, %v771_v2, %v767_v40 }
 0x114   :  { %v853_v60 = vsel %vm852_vm0, %v772_v35, %v614_v27 }
 0x115   :  { %v855_v56 = vpack.c.b16 %v853_v60, %v853_v60 }
 0x117   :  { %988 = vmatmul.mubr.bf16.vlgmr.msra.gmra.mxu0 %v855_v56 }
 0x1d7   :  { %v1202_v58 = vpop.f32.mrf.mxu0 }
 0x1d9   :  { %v1203_v59 = vpop.f32.mrf.mxu0 }
 0x1da   :  { %v1204_v36 = vadd.f32 %v1203_v59, %v1202_v58 }
 0x1db   :  { %v1205_v63 = vpop.f32.mrf.mxu0 }
 0x1dc   :  { %v990_v9 = vadd.f32 %v1204_v36, %v1010_v57 }
 0x1dd   :  { %v1206_v11 = vpop.f32.mrf.mxu0 }
 0x1de   :  { %995 = vst [vmem:[#allocation2] sm:$0x3] %v990_v9 }
 0x1df   :  { %1236 = shalt.err (!%p1233_p4)
}
 0x1e0   :  { %1005 = dma.vmem_to_hbm [thread:$0]  %s1003_s28, 32, %s1667_s3, [#allocation3]  }
 0x1e1   :  { %1245 = dma.done.wait [#allocation3], 32  }
 0x1e2   :  { %1246 = vsyncadd [#allocation3], 4294967264 }
 0x1e3   :  { %1009 = vsyncpa [#allocation3], 1 }

</bundles_post_ra>
